<compile_context>
chip_gen: v5e
topology: v5e:2x2
jax: 0.10.0
libtpu: 0.0.40
codegen_flags: <defaults>
</compile_context>

<pallas_src>
import numpy as np
import jax
import jax.numpy as jnp
from jax.experimental import pallas as pl
from jax.experimental.pallas import tpu as pltpu

TILE_B_MAX = 2048   # grid block width (lanes); capped per v7x VMEM guidance
SUB_LANES = 512     # inner fori_loop sub-slice; bounds vreg / live pressure

CONFIG = {
    "type": "autoencoder",
    "embedding_dim": 8,
    "flattened_dim": 32,        # n_channels * feature_map_length = 8 * 4
    "feature_map_length": 4,
    "input_shape": (1, 16),     # (C_in, L)
}


# ----------------------------------------------------------------------------
# Fused forward kernel: 7 small MXU dots + bias adds + maximums, nothing else.
# Activations live as (channel*length, batch) slabs -> batch on lanes.
# ----------------------------------------------------------------------------
def _fused_forward_kernel(
    x_ref,                                     # (16, B)  input rows = length positions
    w1e_ref, w1o_ref, b1_ref,                  # enc conv1 (+relu+pool folded): (32,16)x2, (32,1)
    w2e_ref, w2o_ref, b2_ref,                  # enc conv2 (+relu+pool folded): (32,32)x2, (32,1)
    we_ref, be_ref,                            # embed Linear: (8,32), (8,1)
    m1_ref, c1_ref,                            # decode Linear+upsample+dec conv1 folded: (32,8), (32,1)
    m2_ref, c2_ref,                            # upsample+dec conv2 folded: (16,32), (16,1)
    rec_ref, emb_ref,                          # outputs: (16, B), (8, B)
):
    f32 = jnp.float32
    B = x_ref.shape[-1]
    sub = min(SUB_LANES, B)
    n_sub = B // sub                            # tile width is always a multiple of sub

    # Hoist the (tiny) weight loads out of the inner loop.
    w1e, w1o, b1 = w1e_ref[...], w1o_ref[...], b1_ref[...]
    w2e, w2o, b2 = w2e_ref[...], w2o_ref[...], b2_ref[...]
    we, be = we_ref[...], be_ref[...]
    m1, c1 = m1_ref[...], c1_ref[...]
    m2, c2 = m2_ref[...], c2_ref[...]

    def dot(a, b_):
        return jnp.dot(a, b_, preferred_element_type=f32)

    def body(j, carry):
        s = pl.ds(pl.multiple_of(j * sub, sub), sub)
        x = x_ref[:, s]                                                       # (16, sub)
        # enc1: conv+relu+maxpool  == relu(max(W_even@x, W_odd@x) + b)
        p1 = jnp.maximum(jnp.maximum(dot(w1e, x), dot(w1o, x)) + b1, 0.0)     # (32, sub)
        # enc2: conv+relu+maxpool
        p2 = jnp.maximum(jnp.maximum(dot(w2e, p1), dot(w2o, p1)) + b2, 0.0)   # (32, sub) == z_flat
        # bottleneck embedding
        emb = dot(we, p2) + be                                                # (8, sub)
        emb_ref[:, s] = emb
        # decode Linear + view + upsample + dec conv1 + relu   (folded -> one matmul)
        d1 = jnp.maximum(dot(m1, emb) + c1, 0.0)                              # (32, sub)
        # upsample + dec conv2                                  (folded -> one matmul)
        rec_ref[:, s] = dot(m2, d1) + c2                                      # (16, sub)
        return carry

    jax.lax.fori_loop(0, n_sub, body, 0, unroll=True)


# ----------------------------------------------------------------------------
# Wrapper: layout plumbing + single pallas_call
# ----------------------------------------------------------------------------
def _round_up(n, m):
    return ((n + m - 1) // m) * m


def forward(params, x):
    """Returns (recon, embedding).  x: (N, 1, 16) float32, NCL layout."""
    N, _, L_in = x.shape
    assert L_in == CONFIG["input_shape"][1], "banded weights were built for L=16"

    tile_b = min(TILE_B_MAX, _round_up(max(N, 1), SUB_LANES))
    n_tiles = pl.cdiv(N, tile_b)
    N_pad = n_tiles * tile_b

    # Batch onto lanes (lane-dense slabs). Tiny per-sample footprint (~64 B).
    x2 = x.reshape(N, L_in).astype(jnp.float32)
    x_t = jnp.pad(x2, ((0, N_pad - N), (0, 0))).T                  # (16, N_pad)

    def batch_spec(rows):
        return pl.BlockSpec((rows, tile_b), lambda i: (0, i))

    def wspec(shape):
        return pl.BlockSpec(shape, lambda i: (0, 0))

    rec_t, emb_t = pl.pallas_call(
        _fused_forward_kernel,
        out_shape=(
            jax.ShapeDtypeStruct((16, N_pad), jnp.float32),
            jax.ShapeDtypeStruct((8, N_pad), jnp.float32),
        ),
        grid=(n_tiles,),
        in_specs=[
            batch_spec(16),                                        # x
            wspec((32, 16)), wspec((32, 16)), wspec((32, 1)),      # enc1 folded
            wspec((32, 32)), wspec((32, 32)), wspec((32, 1)),      # enc2 folded
            wspec((8, 32)), wspec((8, 1)),                         # embed Linear
            wspec((32, 8)), wspec((32, 1)),                        # declin+up+conv1 folded
            wspec((16, 32)), wspec((16, 1)),                       # up+conv2 folded
        ],
        out_specs=(batch_spec(16), batch_spec(8)),
        compiler_params=pltpu.CompilerParams(
            dimension_semantics=("parallel",),                     # megacore / v7x dual-TC
            vmem_limit_bytes=32 * 1024 * 1024,                     # cover big tiles on v5e; <= v7x budget
        ),
    )(
        x_t,
        params["w1e"], params["w1o"], params["bcol1"],
        params["w2e"], params["w2o"], params["bcol2"],
        params["we"], params["be"],
        params["m1"], params["c1"], params["m2"], params["c2"],
    )

    recon = rec_t.T[:N].reshape(N, 1, 16)                          # back to NCL
    embedding = emb_t.T[:N]                                        # (N, 8)

    # ---- _reshape_output: crop or right-pad to the input length ----
    l_out = recon.shape[-1]
    if l_out > L_in:
        recon = recon[..., :L_in]
    elif l_out < L_in:
        recon = jnp.pad(recon, ((0, 0), (0, 0), (0, L_in - l_out)))
    return recon, embedding


# ----------------------------------------------------------------------------
# Parameter init (torch-default uniform) and one-time fold into MXU matrices.
# ----------------------------------------------------------------------------
def _uniform(key, shape, fan_in):
    bound = 1.0 / float(fan_in) ** 0.5
    return jax.random.uniform(key, shape, jnp.float32, -bound, bound)


def init_raw_params(key):
    keys = jax.random.split(key, 12)
    raw = {}
    raw["enc1_w"] = _uniform(keys[0], (4, 1, 3), 1 * 3)
    raw["enc1_b"] = _uniform(keys[1], (4,), 1 * 3)
    raw["enc2_w"] = _uniform(keys[2], (8, 4, 3), 4 * 3)
    raw["enc2_b"] = _uniform(keys[3], (8,), 4 * 3)
    raw["emb_w"] = _uniform(keys[4], (8, 32), 32)
    raw["emb_b"] = _uniform(keys[5], (8,), 32)
    raw["declin_w"] = _uniform(keys[6], (32, 8), 8)
    raw["declin_b"] = _uniform(keys[7], (32,), 8)
    raw["dec1_w"] = _uniform(keys[8], (4, 8, 3), 8 * 3)
    raw["dec1_b"] = _uniform(keys[9], (4,), 8 * 3)
    raw["dec2_w"] = _uniform(keys[10], (1, 4, 3), 4 * 3)
    raw["dec2_b"] = _uniform(keys[11], (1,), 4 * 3)
    return raw


def _conv_band_matrix(w, L):
    """Conv1d(k=3, pad=1) as a banded matrix over stacked (channel*length) rows."""
    w = np.asarray(w, np.float32)
    c_out, c_in, K = w.shape
    M = np.zeros((c_out * L, c_in * L), np.float32)
    for co in range(c_out):
        for ci in range(c_in):
            for k in range(K):
                off = k - (K // 2)
                for l in range(L):
                    src = l + off
                    if 0 <= src < L:
                        M[co * L + l, ci * L + src] = w[co, ci, k]
    return M


def _upsample2_matrix(C, L):
    """Nearest-neighbour x2 upsample (C, L) -> (C, 2L) as a 0/1 matrix on stacked rows."""
    U = np.zeros((C * 2 * L, C * L), np.float32)
    for c in range(C):
        for j in range(2 * L):
            U[c * 2 * L + j, c * L + j // 2] = 1.0
    return U


def _bias_rows(b, L):
    return np.repeat(np.asarray(b, np.float32), L)[:, None]       # (C*L, 1)


def prepare_params(raw):
    """Fold convs / pools / upsamples / linears into kernel-ready MXU matrices (runs once)."""
    L0, L1, L2 = 16, 8, 4

    # Encoder conv1 + ReLU + MaxPool(2): pool folded by splitting even/odd output rows
    # (maxpool(relu(y)) == relu(max(y_even, y_odd)); bias is identical on both rows).
    B1 = _conv_band_matrix(raw["enc1_w"], L0)                      # (64, 16)
    b1 = _bias_rows(raw["enc1_b"], L0)                             # (64, 1)
    # Encoder conv2 + ReLU + MaxPool(2)
    B2 = _conv_band_matrix(raw["enc2_w"], L1)                      # (64, 32)
    b2 = _bias_rows(raw["enc2_b"], L1)                             # (64, 1)

    we = np.asarray(raw["emb_w"], np.float32)                      # (8, 32)
    be = np.asarray(raw["emb_b"], np.float32)[:, None]             # (8, 1)
    wd = np.asarray(raw["declin_w"], np.float32)                   # (32, 8)
    bd = np.asarray(raw["declin_b"], np.float32)[:, None]          # (32, 1)

    # Decoder stage 1: Linear(8,32) -> view(8ch,4) -> Upsample(x2) -> Conv1d(8,4) (+ReLU after).
    # All linear before the ReLU -> fold into one (32, 8) matrix + (32, 1) bias.
    U1 = _upsample2_matrix(8, L2)                                  # (64, 32)
    D1 = _conv_band_matrix(raw["dec1_w"], L1)                      # (32, 64)
    m1 = D1 @ U1 @ wd                                              # (32, 8)
    c1 = D1 @ U1 @ bd + _bias_rows(raw["dec1_b"], L1)              # (32, 1)

    # Decoder stage 2: Upsample(x2) -> Conv1d(4,1) -> fold into one (16, 32) matrix.
    U2 = _upsample2_matrix(4, L1)                                  # (64, 32)
    D2 = _conv_band_matrix(raw["dec2_w"], L0)                      # (16, 64)
    m2 = D2 @ U2                                                   # (16, 32)
    c2 = _bias_rows(raw["dec2_b"], L0)                             # (16, 1)

    p = {
        "w1e": B1[0::2], "w1o": B1[1::2], "bcol1": b1[0::2],
        "w2e": B2[0::2], "w2o": B2[1::2], "bcol2": b2[0::2],
        "we": we, "be": be,
        "m1": m1, "c1": c1, "m2": m2, "c2": c2,
    }
    return {k: jnp.asarray(v, jnp.float32) for k, v in p.items()}


# ----------------------------------------------------------------------------
# Plain-JAX mirror of the assumed torch architecture (self-check only).
# ----------------------------------------------------------------------------
def _reference_forward(raw, x):
    def conv1d(h, w, b):
        y = jax.lax.conv_general_dilated(
            h, w, window_strides=(1,), padding=((1, 1),),
            dimension_numbers=("NCH", "OIH", "NCH"))
        return y + b[None, :, None]

    def pool2(h):
        return jnp.maximum(h[..., 0::2], h[..., 1::2])

    def up2(h):
        return jnp.repeat(h, 2, axis=-1)

    h = pool2(jax.nn.relu(conv1d(x, raw["enc1_w"], raw["enc1_b"])))
    h = pool2(jax.nn.relu(conv1d(h, raw["enc2_w"], raw["enc2_b"])))
    zf = h.reshape(h.shape[0], -1)
    emb = zf @ raw["emb_w"].T + raw["emb_b"]
    ze = emb @ raw["declin_w"].T + raw["declin_b"]
    z = ze.reshape(-1, 8, 4)
    d = jax.nn.relu(conv1d(up2(z), raw["dec1_w"], raw["dec1_b"]))
    rec = conv1d(up2(d), raw["dec2_w"], raw["dec2_b"])
    return rec, emb


if __name__ == "__main__":
    key = jax.random.PRNGKey(0)
    k_param, k_input = jax.random.split(key)
    raw = init_raw_params(k_param)
    params = prepare_params(raw)
    x = jax.random.normal(k_input, (2, 1, 16), dtype=jnp.float32)   # (batch, channels, length)

    fwd = jax.jit(forward)
    recon, embedding = fwd(params, x)
    recon = jax.block_until_ready(recon)
    embedding = jax.block_until_ready(embedding)

    assert recon.shape == x.shape, recon.shape
    assert embedding.shape == (2, CONFIG["embedding_dim"]), embedding.shape

    # Numerical self-check against the plain-JAX reference (tolerance covers
    # MXU/bf16-pass rounding, far below any structural-error magnitude).
    ref_rec, ref_emb = _reference_forward(raw, x)
    np.testing.assert_allclose(np.asarray(embedding), np.asarray(ref_emb), rtol=2e-2, atol=2e-2)
    np.testing.assert_allclose(np.asarray(recon), np.asarray(ref_rec), rtol=2e-2, atol=2e-2)

    print("KERNEL_OK")
</pallas_src>

<mosaic_0001>
module attributes {stable_mosaic.version = 11 : i64} {
  func.func @_fused_forward_kernel(%arg0: i32, %arg1: memref<16x512xf32, #tpu.memory_space<vmem>>, %arg2: memref<32x16xf32, #tpu.memory_space<vmem>>, %arg3: memref<32x16xf32, #tpu.memory_space<vmem>>, %arg4: memref<32x1xf32, #tpu.memory_space<vmem>>, %arg5: memref<32x32xf32, #tpu.memory_space<vmem>>, %arg6: memref<32x32xf32, #tpu.memory_space<vmem>>, %arg7: memref<32x1xf32, #tpu.memory_space<vmem>>, %arg8: memref<8x32xf32, #tpu.memory_space<vmem>>, %arg9: memref<8x1xf32, #tpu.memory_space<vmem>>, %arg10: memref<32x8xf32, #tpu.memory_space<vmem>>, %arg11: memref<32x1xf32, #tpu.memory_space<vmem>>, %arg12: memref<16x32xf32, #tpu.memory_space<vmem>>, %arg13: memref<16x1xf32, #tpu.memory_space<vmem>>, %arg14: memref<16x512xf32, #tpu.memory_space<vmem>>, %arg15: memref<8x512xf32, #tpu.memory_space<vmem>>) attributes {dimension_semantics = [#tpu.dimension_semantics<parallel>], iteration_bounds = array<i64: 1>, scalar_prefetch = 0 : i64, scratch_operands = 0 : i64, tpu.core_type = #tpu.core_type<tc>, window_params = [{transform_indices = @transform_0, window_bounds = array<i64: 16, 512>}, {pipeline_mode = #tpu.pipeline_mode<synchronous>, transform_indices = @transform_1, window_bounds = array<i64: 32, 16>}, {pipeline_mode = #tpu.pipeline_mode<synchronous>, transform_indices = @transform_2, window_bounds = array<i64: 32, 16>}, {pipeline_mode = #tpu.pipeline_mode<synchronous>, transform_indices = @transform_3, window_bounds = array<i64: 32, 1>}, {pipeline_mode = #tpu.pipeline_mode<synchronous>, transform_indices = @transform_4, window_bounds = array<i64: 32, 32>}, {pipeline_mode = #tpu.pipeline_mode<synchronous>, transform_indices = @transform_5, window_bounds = array<i64: 32, 32>}, {pipeline_mode = #tpu.pipeline_mode<synchronous>, transform_indices = @transform_6, window_bounds = array<i64: 32, 1>}, {pipeline_mode = #tpu.pipeline_mode<synchronous>, transform_indices = @transform_7, window_bounds = array<i64: 8, 32>}, {pipeline_mode = #tpu.pipeline_mode<synchronous>, transform_indices = @transform_8, window_bounds = array<i64: 8, 1>}, {pipeline_mode = #tpu.pipeline_mode<synchronous>, transform_indices = @transform_9, window_bounds = array<i64: 32, 8>}, {pipeline_mode = #tpu.pipeline_mode<synchronous>, transform_indices = @transform_10, window_bounds = array<i64: 32, 1>}, {pipeline_mode = #tpu.pipeline_mode<synchronous>, transform_indices = @transform_11, window_bounds = array<i64: 16, 32>}, {pipeline_mode = #tpu.pipeline_mode<synchronous>, transform_indices = @transform_12, window_bounds = array<i64: 16, 1>}, {transform_indices = @transform_13, window_bounds = array<i64: 16, 512>}, {transform_indices = @transform_14, window_bounds = array<i64: 8, 512>}]} {
    %c0 = arith.constant 0 : index
    %c0_0 = arith.constant 0 : index
    %0 = vector.load %arg2[%c0, %c0_0] : memref<32x16xf32, #tpu.memory_space<vmem>>, vector<32x16xf32>
    %c0_1 = arith.constant 0 : index
    %c0_2 = arith.constant 0 : index
    %1 = vector.load %arg3[%c0_1, %c0_2] : memref<32x16xf32, #tpu.memory_space<vmem>>, vector<32x16xf32>
    %c0_3 = arith.constant 0 : index
    %c0_4 = arith.constant 0 : index
    %2 = vector.load %arg4[%c0_3, %c0_4] : memref<32x1xf32, #tpu.memory_space<vmem>>, vector<32x1xf32>
    %c0_5 = arith.constant 0 : index
    %c0_6 = arith.constant 0 : index
    %3 = vector.load %arg5[%c0_5, %c0_6] : memref<32x32xf32, #tpu.memory_space<vmem>>, vector<32x32xf32>
    %c0_7 = arith.constant 0 : index
    %c0_8 = arith.constant 0 : index
    %4 = vector.load %arg6[%c0_7, %c0_8] : memref<32x32xf32, #tpu.memory_space<vmem>>, vector<32x32xf32>
    %c0_9 = arith.constant 0 : index
    %c0_10 = arith.constant 0 : index
    %5 = vector.load %arg7[%c0_9, %c0_10] : memref<32x1xf32, #tpu.memory_space<vmem>>, vector<32x1xf32>
    %c0_11 = arith.constant 0 : index
    %c0_12 = arith.constant 0 : index
    %6 = vector.load %arg8[%c0_11, %c0_12] : memref<8x32xf32, #tpu.memory_space<vmem>>, vector<8x32xf32>
    %c0_13 = arith.constant 0 : index
    %c0_14 = arith.constant 0 : index
    %7 = vector.load %arg9[%c0_13, %c0_14] : memref<8x1xf32, #tpu.memory_space<vmem>>, vector<8x1xf32>
    %c0_15 = arith.constant 0 : index
    %c0_16 = arith.constant 0 : index
    %8 = vector.load %arg10[%c0_15, %c0_16] : memref<32x8xf32, #tpu.memory_space<vmem>>, vector<32x8xf32>
    %c0_17 = arith.constant 0 : index
    %c0_18 = arith.constant 0 : index
    %9 = vector.load %arg11[%c0_17, %c0_18] : memref<32x1xf32, #tpu.memory_space<vmem>>, vector<32x1xf32>
    %c0_19 = arith.constant 0 : index
    %c0_20 = arith.constant 0 : index
    %10 = vector.load %arg12[%c0_19, %c0_20] : memref<16x32xf32, #tpu.memory_space<vmem>>, vector<16x32xf32>
    %c0_21 = arith.constant 0 : index
    %c0_22 = arith.constant 0 : index
    %11 = vector.load %arg13[%c0_21, %c0_22] : memref<16x1xf32, #tpu.memory_space<vmem>>, vector<16x1xf32>
    %c0_i32 = arith.constant 0 : i32
    %c512_i32 = arith.constant 512 : i32
    %12 = arith.muli %c0_i32, %c512_i32 : i32
    %13 = tpu.assume_multiple %12, 512 : i32
    %c0_23 = arith.constant 0 : index
    %14 = arith.index_cast %13 : i32 to index
    %15 = vector.load %arg1[%c0_23, %14] : memref<16x512xf32, #tpu.memory_space<vmem>>, vector<16x512xf32>
    %cst = arith.constant dense<0.000000e+00> : vector<32x512xf32>
    %16 = tpu.matmul %0, %15, %cst {dimension_numbers = #tpu.dot_dimension_numbers<[1], [0], [0], [1], [0, 0, 1, 1], [], []>} : vector<32x16xf32>, vector<16x512xf32>, vector<32x512xf32> -> vector<32x512xf32>
    %cst_24 = arith.constant dense<0.000000e+00> : vector<32x512xf32>
    %17 = tpu.matmul %1, %15, %cst_24 {dimension_numbers = #tpu.dot_dimension_numbers<[1], [0], [0], [1], [0, 0, 1, 1], [], []>} : vector<32x16xf32>, vector<16x512xf32>, vector<32x512xf32> -> vector<32x512xf32>
    %18 = arith.maximumf %16, %17 : vector<32x512xf32>
    %19 = vector.broadcast %2 : vector<32x1xf32> to vector<32x512xf32>
    %20 = arith.addf %18, %19 : vector<32x512xf32>
    %cst_25 = arith.constant 0.000000e+00 : f32
    %21 = vector.broadcast %cst_25 : f32 to vector<32x512xf32>
    %22 = arith.maximumf %20, %21 : vector<32x512xf32>
    %cst_26 = arith.constant dense<0.000000e+00> : vector<32x512xf32>
    %23 = tpu.matmul %3, %22, %cst_26 {dimension_numbers = #tpu.dot_dimension_numbers<[1], [0], [0], [1], [0, 0, 1, 1], [], []>} : vector<32x32xf32>, vector<32x512xf32>, vector<32x512xf32> -> vector<32x512xf32>
    %cst_27 = arith.constant dense<0.000000e+00> : vector<32x512xf32>
    %24 = tpu.matmul %4, %22, %cst_27 {dimension_numbers = #tpu.dot_dimension_numbers<[1], [0], [0], [1], [0, 0, 1, 1], [], []>} : vector<32x32xf32>, vector<32x512xf32>, vector<32x512xf32> -> vector<32x512xf32>
    %25 = arith.maximumf %23, %24 : vector<32x512xf32>
    %26 = vector.broadcast %5 : vector<32x1xf32> to vector<32x512xf32>
    %27 = arith.addf %25, %26 : vector<32x512xf32>
    %cst_28 = arith.constant 0.000000e+00 : f32
    %28 = vector.broadcast %cst_28 : f32 to vector<32x512xf32>
    %29 = arith.maximumf %27, %28 : vector<32x512xf32>
    %cst_29 = arith.constant dense<0.000000e+00> : vector<8x512xf32>
    %30 = tpu.matmul %6, %29, %cst_29 {dimension_numbers = #tpu.dot_dimension_numbers<[1], [0], [0], [1], [0, 0, 1, 1], [], []>} : vector<8x32xf32>, vector<32x512xf32>, vector<8x512xf32> -> vector<8x512xf32>
    %31 = vector.broadcast %7 : vector<8x1xf32> to vector<8x512xf32>
    %32 = arith.addf %30, %31 : vector<8x512xf32>
    %c0_30 = arith.constant 0 : index
    %33 = arith.index_cast %13 : i32 to index
    %34 = vector.load %arg15[%c0_30, %33] : memref<8x512xf32, #tpu.memory_space<vmem>>, vector<8x512xf32>
    tpu.vector_store %arg15[%c0_30, %33], %32 {strides = array<i32>} : memref<8x512xf32, #tpu.memory_space<vmem>>, vector<8x512xf32>,
    %cst_31 = arith.constant dense<0.000000e+00> : vector<32x512xf32>
    %35 = tpu.matmul %8, %32, %cst_31 {dimension_numbers = #tpu.dot_dimension_numbers<[1], [0], [0], [1], [0, 0, 1, 1], [], []>} : vector<32x8xf32>, vector<8x512xf32>, vector<32x512xf32> -> vector<32x512xf32>
    %36 = vector.broadcast %9 : vector<32x1xf32> to vector<32x512xf32>
    %37 = arith.addf %35, %36 : vector<32x512xf32>
    %cst_32 = arith.constant 0.000000e+00 : f32
    %38 = vector.broadcast %cst_32 : f32 to vector<32x512xf32>
    %39 = arith.maximumf %37, %38 : vector<32x512xf32>
    %cst_33 = arith.constant dense<0.000000e+00> : vector<16x512xf32>
    %40 = tpu.matmul %10, %39, %cst_33 {dimension_numbers = #tpu.dot_dimension_numbers<[1], [0], [0], [1], [0, 0, 1, 1], [], []>} : vector<16x32xf32>, vector<32x512xf32>, vector<16x512xf32> -> vector<16x512xf32>
    %41 = vector.broadcast %11 : vector<16x1xf32> to vector<16x512xf32>
    %42 = arith.addf %40, %41 : vector<16x512xf32>
    %c0_34 = arith.constant 0 : index
    %43 = arith.index_cast %13 : i32 to index
    %44 = vector.load %arg14[%c0_34, %43] : memref<16x512xf32, #tpu.memory_space<vmem>>, vector<16x512xf32>
    tpu.vector_store %arg14[%c0_34, %43], %42 {strides = array<i32>} : memref<16x512xf32, #tpu.memory_space<vmem>>, vector<16x512xf32>,
    %c1_i32 = arith.constant 1 : i32
    return
  }
  func.func @transform_0(%arg0: i32) -> (i32, i32) {
    %c0_i32 = arith.constant 0 : i32
    %c0_i32_0 = arith.constant 0 : i32
    return %c0_i32, %arg0 : i32, i32
  }
  func.func @transform_1(%arg0: i32) -> (i32, i32) {
    %c0_i32 = arith.constant 0 : i32
    %c0_i32_0 = arith.constant 0 : i32
    %c0_i32_1 = arith.constant 0 : i32
    return %c0_i32, %c0_i32_0 : i32, i32
  }
  func.func @transform_2(%arg0: i32) -> (i32, i32) {
    %c0_i32 = arith.constant 0 : i32
    %c0_i32_0 = arith.constant 0 : i32
    %c0_i32_1 = arith.constant 0 : i32
    return %c0_i32, %c0_i32_0 : i32, i32
  }
  func.func @transform_3(%arg0: i32) -> (i32, i32) {
    %c0_i32 = arith.constant 0 : i32
    %c0_i32_0 = arith.constant 0 : i32
    %c0_i32_1 = arith.constant 0 : i32
    return %c0_i32, %c0_i32_0 : i32, i32
  }
  func.func @transform_4(%arg0: i32) -> (i32, i32) {
    %c0_i32 = arith.constant 0 : i32
    %c0_i32_0 = arith.constant 0 : i32
    %c0_i32_1 = arith.constant 0 : i32
    return %c0_i32, %c0_i32_0 : i32, i32
  }
  func.func @transform_5(%arg0: i32) -> (i32, i32) {
    %c0_i32 = arith.constant 0 : i32
    %c0_i32_0 = arith.constant 0 : i32
    %c0_i32_1 = arith.constant 0 : i32
    return %c0_i32, %c0_i32_0 : i32, i32
  }
  func.func @transform_6(%arg0: i32) -> (i32, i32) {
    %c0_i32 = arith.constant 0 : i32
    %c0_i32_0 = arith.constant 0 : i32
    %c0_i32_1 = arith.constant 0 : i32
    return %c0_i32, %c0_i32_0 : i32, i32
  }
  func.func @transform_7(%arg0: i32) -> (i32, i32) {
    %c0_i32 = arith.constant 0 : i32
    %c0_i32_0 = arith.constant 0 : i32
    %c0_i32_1 = arith.constant 0 : i32
    return %c0_i32, %c0_i32_0 : i32, i32
  }
  func.func @transform_8(%arg0: i32) -> (i32, i32) {
    %c0_i32 = arith.constant 0 : i32
    %c0_i32_0 = arith.constant 0 : i32
    %c0_i32_1 = arith.constant 0 : i32
    return %c0_i32, %c0_i32_0 : i32, i32
  }
  func.func @transform_9(%arg0: i32) -> (i32, i32) {
    %c0_i32 = arith.constant 0 : i32
    %c0_i32_0 = arith.constant 0 : i32
    %c0_i32_1 = arith.constant 0 : i32
    return %c0_i32, %c0_i32_0 : i32, i32
  }
  func.func @transform_10(%arg0: i32) -> (i32, i32) {
    %c0_i32 = arith.constant 0 : i32
    %c0_i32_0 = arith.constant 0 : i32
    %c0_i32_1 = arith.constant 0 : i32
    return %c0_i32, %c0_i32_0 : i32, i32
  }
  func.func @transform_11(%arg0: i32) -> (i32, i32) {
    %c0_i32 = arith.constant 0 : i32
    %c0_i32_0 = arith.constant 0 : i32
    %c0_i32_1 = arith.constant 0 : i32
    return %c0_i32, %c0_i32_0 : i32, i32
  }
  func.func @transform_12(%arg0: i32) -> (i32, i32) {
    %c0_i32 = arith.constant 0 : i32
    %c0_i32_0 = arith.constant 0 : i32
    %c0_i32_1 = arith.constant 0 : i32
    return %c0_i32, %c0_i32_0 : i32, i32
  }
  func.func @transform_13(%arg0: i32) -> (i32, i32) {
    %c0_i32 = arith.constant 0 : i32
    %c0_i32_0 = arith.constant 0 : i32
    return %c0_i32, %arg0 : i32, i32
  }
  func.func @transform_14(%arg0: i32) -> (i32, i32) {
    %c0_i32 = arith.constant 0 : i32
    %c0_i32_0 = arith.constant 0 : i32
    return %c0_i32, %arg0 : i32, i32
  }
}

</mosaic_0001>

<bundles_post_ra>
// kernel: forward.1
= control target key start
LH: loop header
LB: loop body
LE: loop exit
PB: predicated region body
PF: predicated region fallthrough
CT: control target
= control target key end

     0   :  { %vm92_vm0 = vcmask 130048   ;;  %v1219_v12 = vmov 0   ;;  %vm417_vm1 = vcmask 261120   ;;  %vm854_vm2 = vcmask 64512   ;;  %s1621_s0 = inlined_call_operand.vmem [shape: f32[16,512], index: 0, kind: input, shape index: {}]   ;;  %s1622_s1 = inlined_call_operand.vmem [shape: f32[32,16], index: 1, kind: input, shape index: {}]   ;;  %s1623_s3 = inlined_call_operand.vmem [shape: f32[32,1], index: 3, kind: input, shape index: {}]   ;;  %s1624_s6 = inlined_call_operand.vmem [shape: f32[32,1], index: 6, kind: input, shape index: {}]   ;;  %s1625_s10 = inlined_call_operand.vmem [shape: f32[32,1], index: 10, kind: input, shape index: {}]   ;;  %s1626_s2 = inlined_call_operand.vmem [shape: f32[32,16], index: 2, kind: input, shape index: {}]   ;;  %s1627_s12 = inlined_call_operand.vmem [shape: f32[16,1], index: 12, kind: input, shape index: {}]   ;;  %s1628_s4 = inlined_call_operand.vmem [shape: f32[32,32], index: 4, kind: input, shape index: {}]   ;;  %s1629_s5 = inlined_call_operand.vmem [shape: f32[32,32], index: 5, kind: input, shape index: {}]   ;;  %s1630_s8 = inlined_call_operand.vmem [shape: f32[8,1], index: 8, kind: input, shape index: {}]   ;;  %s1631_s7 = inlined_call_operand.vmem [shape: f32[8,32], index: 7, kind: input, shape index: {}]   ;;  %s1632_s9 = inlined_call_operand.vmem [shape: f32[32,8], index: 9, kind: input, shape index: {}]   ;;  %s1633_s14 = inlined_call_operand.vmem [shape: f32[8,512], index: 14, kind: output, shape index: {1}]   ;;  %s1634_s11 = inlined_call_operand.vmem [shape: f32[16,32], index: 11, kind: input, shape index: {}]   ;;  %s1635_s13 = inlined_call_operand.vmem [shape: f32[16,512], index: 13, kind: output, shape index: {0}]  }
   0x1   :  { %v88_v0 = vld [vmem:[%s1621_s0 + $0x20] sm:$0xff]  ;;  %v89_v1 = vld [vmem:[%s1621_s0 + $0x28] sm:$0xff]  ;;  %v90_v2 = vld [vmem:[%s1621_s0 + $0x30] sm:$0xff]  ;;  %1217 = vset.pattern.permute.xlu1 %v1219_v12  ;;  %1216 = vset.pattern.permute.xlu0 %v1219_v12 }
   0x2   :  { %119 = vmatpush.msra.mxu0 %v88_v0  ;;  %148 = vmatpush.msra.mxu1 %v89_v1  ;;  %v91_v3 = vld [vmem:[%s1621_s0 + $0x38] sm:$0xff]  ;;  %v84_v4 = vld [vmem:[%s1621_s0] sm:$0xff]  ;;  %v85_v5 = vld [vmem:[%s1621_s0 + $0x8] sm:$0xff] }
   0x3   :  { %177 = vmatpush.msra.mxu2 %v90_v2  ;;  %206 = vmatpush.msra.mxu3 %v91_v3  ;;  %v86_v6 = vld [vmem:[%s1621_s0 + $0x10] sm:$0xff]  ;;  %v87_v7 = vld [vmem:[%s1621_s0 + $0x18] sm:$0xff]  ;;  %v46_v8 = vld [vmem:[%s1622_s1] sm:$0xff] }
   0x4   :  { %120 = vmatpush.msra.mxu0 %v84_v4  ;;  %149 = vmatpush.msra.mxu1 %v85_v5  ;;  %v57_v9 = vld [vmem:[%s1623_s3 + $0x18] sm:$0xff]  ;;  %v55_v10 = vld [vmem:[%s1623_s3 + $0x8] sm:$0xff]  ;;  %v56_v13 = vld [vmem:[%s1623_s3 + $0x10] sm:$0xff] }
   0x5   :  { %178 = vmatpush.msra.mxu2 %v86_v6  ;;  %207 = vmatpush.msra.mxu3 %v87_v7  ;;  %v47_v11 = vld [vmem:[%s1622_s1 + $0x8] sm:$0xff]  ;;  %v54_v14 = vld [vmem:[%s1623_s3] sm:$0xff]  ;;  %v48_v15 = vld [vmem:[%s1622_s1 + $0x10] sm:$0xff] }
   0x6   :  { %1123 = vmatmul.msk.f32.vlgmr.msra.gmra.mxu0 %vm92_vm0, %v46_v8  ;;  %1127 = vmatmul.msk.f32.vlgmr.msra.gmra.mxu1 %vm92_vm0, %v46_v8  ;;  %v67_v16 = vld [vmem:[%s1624_s6 + $0x8] sm:$0xff]  ;;  %v49_v17 = vld [vmem:[%s1622_s1 + $0x18] sm:$0xff]  ;;  %v66_v18 = vld [vmem:[%s1624_s6] sm:$0xff] }
   0x7   :  { %1131 = vmatmul.msk.f32.vlgmr.msra.gmra.mxu2 %vm92_vm0, %v46_v8  ;;  %1135 = vmatmul.msk.f32.vlgmr.msra.gmra.mxu3 %vm92_vm0, %v46_v8  ;;  %v79_v19 = vld [vmem:[%s1625_s10 + $0x18] sm:$0xff]  ;;  %v50_v20 = vld [vmem:[%s1626_s2] sm:$0xff]  ;;  %v78_v21 = vld [vmem:[%s1625_s10 + $0x10] sm:$0xff] }
   0x8   :  { %305 = vmatpush.msrb.mxu2 %v90_v2  ;;  %334 = vmatpush.msrb.mxu3 %v91_v3  ;;  %v76_v22 = vld [vmem:[%s1625_s10] sm:$0xff]  ;;  %v51_v23 = vld [vmem:[%s1626_s2 + $0x8] sm:$0xff]  ;;  %v52_v25 = vld [vmem:[%s1626_s2 + $0x10] sm:$0xff] }
   0x9   :  { %247 = vmatpush.msrb.mxu0 %v88_v0  ;;  %276 = vmatpush.msrb.mxu1 %v89_v1  ;;  %v82_v24 = vld [vmem:[%s1627_s12] sm:$0xff]  ;;  %v53_v26 = vld [vmem:[%s1626_s2 + $0x18] sm:$0xff] }
   0xa   :  { %306 = vmatpush.msrb.mxu2 %v86_v6  ;;  %335 = vmatpush.msrb.mxu3 %v87_v7 }
   0xb   :  { %248 = vmatpush.msrb.mxu0 %v84_v4  ;;  %277 = vmatpush.msrb.mxu1 %v85_v5 }
   0xc   :  { %382 = vperm.xlu0 %1216, %v57_v9   ;;  %372 = vperm.xlu1 %1217, %v55_v10  }
   0xd   :  { %1218 = vset.pattern.permute.xlu2 %v1219_v12 }
   0xe   :  { %1124 = vmatmul.msk.f32.gmra.mxu0 %vm92_vm0, %v47_v11  ;;  %1128 = vmatmul.msk.f32.gmra.mxu1 %vm92_vm0, %v47_v11 }
   0xf   :  { %1132 = vmatmul.msk.f32.gmra.mxu2 %vm92_vm0, %v47_v11  ;;  %1136 = vmatmul.msk.f32.gmra.mxu3 %vm92_vm0, %v47_v11 }
  0x14   :  { %377 = vperm.xlu0 %1216, %v56_v13   ;;  %367 = vperm.xlu1 %1217, %v54_v14  }
  0x16   :  { %1125 = vmatmul.msk.f32.gmra.mxu0 %vm92_vm0, %v48_v15  ;;  %1129 = vmatmul.msk.f32.gmra.mxu1 %vm92_vm0, %v48_v15 }
  0x17   :  { %1133 = vmatmul.msk.f32.gmra.mxu2 %vm92_vm0, %v48_v15  ;;  %1137 = vmatmul.msk.f32.gmra.mxu3 %vm92_vm0, %v48_v15 }
  0x1c   :  { %697 = vperm.xlu0 %1216, %v67_v16   ;;  %692 = vperm.xlu1 %1217, %v66_v18  }
  0x1e   :  { %1126 = vmatmul.msk.f32.gmra.mxu0 %vm92_vm0, %v49_v17  ;;  %1130 = vmatmul.msk.f32.gmra.mxu1 %vm92_vm0, %v49_v17 }
  0x1f   :  { %1134 = vmatmul.msk.f32.gmra.mxu2 %vm92_vm0, %v49_v17  ;;  %1138 = vmatmul.msk.f32.gmra.mxu3 %vm92_vm0, %v49_v17 }
  0x24   :  { %851 = vperm.xlu0 %1216, %v79_v19   ;;  %846 = vperm.xlu1 %1217, %v78_v21  }
  0x26   :  { %1139 = vmatmul.msk.f32.vlgmr.msrb.gmra.mxu0 %vm92_vm0, %v50_v20  ;;  %1143 = vmatmul.msk.f32.vlgmr.msrb.gmra.mxu1 %vm92_vm0, %v50_v20 }
  0x27   :  { %1147 = vmatmul.msk.f32.vlgmr.msrb.gmra.mxu2 %vm92_vm0, %v50_v20  ;;  %1151 = vmatmul.msk.f32.vlgmr.msrb.gmra.mxu3 %vm92_vm0, %v50_v20 }
  0x2c   :  { %836 = vperm.xlu0 %1216, %v76_v22   ;;  %1001 = vperm.xlu1 %1217, %v82_v24  }
  0x2e   :  { %1140 = vmatmul.msk.f32.gmra.mxu0 %vm92_vm0, %v51_v23  ;;  %1144 = vmatmul.msk.f32.gmra.mxu1 %vm92_vm0, %v51_v23 }
  0x2f   :  { %1148 = vmatmul.msk.f32.gmra.mxu2 %vm92_vm0, %v51_v23  ;;  %1152 = vmatmul.msk.f32.gmra.mxu3 %vm92_vm0, %v51_v23 }
  0x36   :  { %1141 = vmatmul.msk.f32.gmra.mxu0 %vm92_vm0, %v52_v25  ;;  %1145 = vmatmul.msk.f32.gmra.mxu1 %vm92_vm0, %v52_v25 }
  0x37   :  { %1149 = vmatmul.msk.f32.gmra.mxu2 %vm92_vm0, %v52_v25  ;;  %1153 = vmatmul.msk.f32.gmra.mxu3 %vm92_vm0, %v52_v25 }
  0x3e   :  { %1142 = vmatmul.msk.f32.gmra.mxu0 %vm92_vm0, %v53_v26  ;;  %1146 = vmatmul.msk.f32.gmra.mxu1 %vm92_vm0, %v53_v26 }
  0x3f   :  { %1150 = vmatmul.msk.f32.gmra.mxu2 %vm92_vm0, %v53_v26  ;;  %1154 = vmatmul.msk.f32.gmra.mxu3 %vm92_vm0, %v53_v26 }
  0x7e   :  { %v383_v49 = vpop.permute.xlu0 %382  ;;  %v373_v54 = vpop.permute.xlu1 %372 }
  0x83   :  { %v122_v27 = vpop.f32.mrf.mxu0  ;;  %v151_v28 = vpop.f32.mrf.mxu1 }
  0x86   :  { %v378_v3 = vpop.permute.xlu0 %377  ;;  %v368_v4 = vpop.permute.xlu1 %367 }
  0x8a   :  { %v1405_v29 = vpop.f32.mrf.mxu2  ;;  %v1407_v30 = vpop.f32.mrf.mxu3 }
  0x8b   :  { %v125_v31 = vpop.f32.mrf.mxu0  ;;  %v154_v32 = vpop.f32.mrf.mxu1 }
  0x92   :  { %v1409_v33 = vpop.f32.mrf.mxu2  ;;  %v1411_v34 = vpop.f32.mrf.mxu3 }
  0x93   :  { %v128_v35 = vpop.f32.mrf.mxu0  ;;  %v157_v36 = vpop.f32.mrf.mxu1 }
  0x9a   :  { %v1413_v37 = vpop.f32.mrf.mxu2  ;;  %v1415_v38 = vpop.f32.mrf.mxu3 }
  0x9b   :  { %v131_v39 = vpop.f32.mrf.mxu0  ;;  %v160_v40 = vpop.f32.mrf.mxu1 }
  0xa2   :  { %v189_v41 = vpop.f32.mrf.mxu2  ;;  %v218_v42 = vpop.f32.mrf.mxu3 }
  0xa3   :  { %v250_v43 = vpop.f32.mrf.mxu0  ;;  %v279_v44 = vpop.f32.mrf.mxu1 }
  0xa4   :  { %v349_v1 = vmax.f32 %v122_v27, %v250_v43  ;;  %v350_v2 = vmax.f32 %v151_v28, %v279_v44 }
  0xa6   :  { %v1421_v13 = vadd.f32 %v368_v4, %v349_v1  ;;  %v1423_v14 = vadd.f32 %v368_v4, %v350_v2 }
  0xaa   :  { %v1417_v45 = vpop.f32.mrf.mxu2  ;;  %v1419_v46 = vpop.f32.mrf.mxu3 }
  0xab   :  { %v253_v47 = vpop.f32.mrf.mxu0  ;;  %v282_v48 = vpop.f32.mrf.mxu1  ;;  %v351_v27 = vmax.f32 %v1405_v29, %v1417_v45 }
  0xac   :  { %v353_v61 = vmax.f32 %v125_v31, %v253_v47  ;;  %v354_v62 = vmax.f32 %v154_v32, %v282_v48  ;;  %v401_v32 = vmax.f32 %v1421_v13, 0.0  ;;  %v59_v48 = vld [vmem:[%s1628_s4 + $0x8] sm:$0xff] }
  0xae   :  { %v389_v9 = vadd.f32 %v373_v54, %v353_v61  ;;  %v390_v10 = vadd.f32 %v373_v54, %v354_v62 }
  0xb0   :  { %v405_v23 = vmax.f32 %v389_v9, 0.0  ;;  %v406_v24 = vmax.f32 %v390_v10, 0.0 }
  0xb2   :  { %v311_v50 = vpop.f32.mrf.mxu2  ;;  %v340_v51 = vpop.f32.mrf.mxu3 }
  0xb3   :  { %v256_v52 = vpop.f32.mrf.mxu0  ;;  %v285_v53 = vpop.f32.mrf.mxu1  ;;  %v355_v25 = vmax.f32 %v1409_v33, %v311_v50  ;;  %v356_v26 = vmax.f32 %v1411_v34, %v340_v51  ;;  %v402_v33 = vmax.f32 %v1423_v14, 0.0  ;;  %v61_v50 = vld [vmem:[%s1628_s4 + $0x18] sm:$0xff]  ;;  %v62_v51 = vld [vmem:[%s1629_s5] sm:$0xff] }
  0xb4   :  { %v357_v55 = vmax.f32 %v128_v35, %v256_v52  ;;  %v358_v56 = vmax.f32 %v157_v36, %v285_v53  ;;  %v352_v35 = vmax.f32 %v1407_v30, %v1419_v46  ;;  %v387_v30 = vadd.f32 %v368_v4, %v351_v27  ;;  %v69_v52 = vld [vmem:[%s1624_s6 + $0x18] sm:$0xff]  ;;  %v68_v53 = vld [vmem:[%s1624_s6 + $0x10] sm:$0xff] }
  0xb5   :  { %v391_v29 = vadd.f32 %v373_v54, %v355_v25  ;;  %707 = vperm.xlu2 %1218, %v69_v52  }
  0xb6   :  { %v393_v5 = vadd.f32 %v378_v3, %v357_v55  ;;  %v394_v6 = vadd.f32 %v378_v3, %v358_v56  ;;  %v403_v46 = vmax.f32 %v387_v30, 0.0  ;;  %v71_v55 = vld [vmem:[%s1630_s8] sm:$0xff]  ;;  %v64_v56 = vld [vmem:[%s1629_s5 + $0x10] sm:$0xff] }
  0xb7   :  { %v407_v44 = vmax.f32 %v391_v29, 0.0 }
  0xb8   :  { %v409_v15 = vmax.f32 %v393_v5, 0.0  ;;  %v410_v16 = vmax.f32 %v394_v6, 0.0 }
  0xba   :  { %v314_v57 = vpop.f32.mrf.mxu2  ;;  %v343_v58 = vpop.f32.mrf.mxu3 }
  0xbb   :  { %v259_v59 = vpop.f32.mrf.mxu0  ;;  %v288_v60 = vpop.f32.mrf.mxu1  ;;  %v359_v17 = vmax.f32 %v1413_v37, %v314_v57  ;;  %v360_v18 = vmax.f32 %v1415_v38, %v343_v58  ;;  %v77_v57 = vld [vmem:[%s1625_s10 + $0x8] sm:$0xff]  ;;  %v65_v58 = vld [vmem:[%s1629_s5 + $0x18] sm:$0xff] }
  0xbc   :  { %v361_v63 = vmax.f32 %v131_v39, %v259_v59  ;;  %v362_v0 = vmax.f32 %v160_v40, %v288_v60  ;;  %v58_v39 = vld [vmem:[%s1628_s4] sm:$0xff]  ;;  %v392_v40 = vadd.f32 %v373_v54, %v356_v26  ;;  %v63_v54 = vld [vmem:[%s1629_s5 + $0x8] sm:$0xff] }
  0xbd   :  { %v395_v36 = vadd.f32 %v378_v3, %v359_v17  ;;  %v396_v37 = vadd.f32 %v378_v3, %v360_v18  ;;  %702 = vperm.xlu2 %1218, %v68_v53   ;;  %v83_v59 = vld [vmem:[%s1627_s12 + $0x8] sm:$0xff] }
  0xbe   :  { %v397_v7 = vadd.f32 %v383_v49, %v361_v63  ;;  %v398_v8 = vadd.f32 %v383_v49, %v362_v0  ;;  %v408_v45 = vmax.f32 %v392_v40, 0.0 }
  0xbf   :  { %v412_v43 = vmax.f32 %v396_v37, 0.0 }
  0xc0   :  { %v413_v11 = vmax.f32 %v397_v7, 0.0  ;;  %v414_v12 = vmax.f32 %v398_v8, 0.0 }
  0xc2   :  { %v317_v19 = vpop.f32.mrf.mxu2  ;;  %v346_v20 = vpop.f32.mrf.mxu3  ;;  %442 = vmatpush.msra.mxu0 %v413_v11  ;;  %471 = vmatpush.msra.mxu1 %v414_v12 }
  0xc3   :  { %v363_v21 = vmax.f32 %v189_v41, %v317_v19  ;;  %v364_v22 = vmax.f32 %v218_v42, %v346_v20  ;;  %v388_v41 = vadd.f32 %v368_v4, %v352_v35  ;;  %v411_v42 = vmax.f32 %v395_v36, 0.0 }
  0xc4   :  { %443 = vmatpush.msra.mxu0 %v409_v15  ;;  %472 = vmatpush.msra.mxu1 %v410_v16 }
  0xc5   :  { %v399_v28 = vadd.f32 %v383_v49, %v363_v21  ;;  %v400_v31 = vadd.f32 %v383_v49, %v364_v22  ;;  %v404_v47 = vmax.f32 %v388_v41, 0.0  ;;  %v60_v49 = vld [vmem:[%s1628_s4 + $0x10] sm:$0xff]  ;;  %744 = vperm.xlu2 %1218, %v71_v55  }
  0xc6   :  { %444 = vmatpush.msra.mxu0 %v405_v23  ;;  %473 = vmatpush.msra.mxu1 %v406_v24 }
  0xc7   :  { %v415_v38 = vmax.f32 %v399_v28, 0.0  ;;  %v416_v34 = vmax.f32 %v400_v31, 0.0 }
  0xc8   :  { %445 = vmatpush.msra.mxu0 %v401_v32  ;;  %474 = vmatpush.msra.mxu1 %v402_v33 }
  0xc9   :  { %500 = vmatpush.msra.mxu2 %v415_v38  ;;  %529 = vmatpush.msra.mxu3 %v416_v34 }
  0xca   :  { %1155 = vmatmul.msk.f32.vlgmr.msra.gmra.mxu0 %vm417_vm1, %v58_v39  ;;  %1159 = vmatmul.msk.f32.vlgmr.msra.gmra.mxu1 %vm417_vm1, %v58_v39 }
  0xcb   :  { %570 = vmatpush.msrb.mxu0 %v413_v11  ;;  %599 = vmatpush.msrb.mxu1 %v414_v12 }
  0xcc   :  { %501 = vmatpush.msra.mxu2 %v411_v42  ;;  %530 = vmatpush.msra.mxu3 %v412_v43 }
  0xcd   :  { %571 = vmatpush.msrb.mxu0 %v409_v15  ;;  %600 = vmatpush.msrb.mxu1 %v410_v16 }
  0xce   :  { %502 = vmatpush.msra.mxu2 %v407_v44  ;;  %531 = vmatpush.msra.mxu3 %v408_v45 }
  0xcf   :  { %572 = vmatpush.msrb.mxu0 %v405_v23  ;;  %601 = vmatpush.msrb.mxu1 %v406_v24 }
  0xd0   :  { %503 = vmatpush.msra.mxu2 %v403_v46  ;;  %532 = vmatpush.msra.mxu3 %v404_v47 }
  0xd1   :  { %1163 = vmatmul.msk.f32.vlgmr.msra.gmra.mxu2 %vm417_vm1, %v58_v39  ;;  %1167 = vmatmul.msk.f32.vlgmr.msra.gmra.mxu3 %vm417_vm1, %v58_v39 }
  0xd2   :  { %573 = vmatpush.msrb.mxu0 %v401_v32  ;;  %602 = vmatpush.msrb.mxu1 %v402_v33  ;;  %v698_v33 = vpop.permute.xlu0 %697 }
  0xd3   :  { %628 = vmatpush.msrb.mxu2 %v415_v38  ;;  %657 = vmatpush.msrb.mxu3 %v416_v34 }
  0xd4   :  { %1156 = vmatmul.msk.f32.gmra.mxu0 %vm417_vm1, %v59_v48  ;;  %1160 = vmatmul.msk.f32.gmra.mxu1 %vm417_vm1, %v59_v48 }
  0xd5   :  { %629 = vmatpush.msrb.mxu2 %v411_v42  ;;  %658 = vmatpush.msrb.mxu3 %v412_v43 }
  0xd6   :  { %841 = vperm.xlu2 %1218, %v77_v57  }
  0xd7   :  { %630 = vmatpush.msrb.mxu2 %v407_v44  ;;  %659 = vmatpush.msrb.mxu3 %v408_v45  ;;  %v693_v45 = vpop.permute.xlu1 %692 }
  0xd9   :  { %631 = vmatpush.msrb.mxu2 %v403_v46  ;;  %660 = vmatpush.msrb.mxu3 %v404_v47 }
  0xda   :  { %1164 = vmatmul.msk.f32.gmra.mxu2 %vm417_vm1, %v59_v48  ;;  %1168 = vmatmul.msk.f32.gmra.mxu3 %vm417_vm1, %v59_v48 }
  0xdc   :  { %1157 = vmatmul.msk.f32.gmra.mxu0 %vm417_vm1, %v60_v49  ;;  %1161 = vmatmul.msk.f32.gmra.mxu1 %vm417_vm1, %v60_v49 }
  0xde   :  { %1006 = vperm.xlu2 %1218, %v83_v59  }
  0xe2   :  { %1165 = vmatmul.msk.f32.gmra.mxu2 %vm417_vm1, %v60_v49  ;;  %1169 = vmatmul.msk.f32.gmra.mxu3 %vm417_vm1, %v60_v49 }
  0xe4   :  { %1158 = vmatmul.msk.f32.gmra.mxu0 %vm417_vm1, %v61_v50  ;;  %1162 = vmatmul.msk.f32.gmra.mxu1 %vm417_vm1, %v61_v50 }
  0xea   :  { %1166 = vmatmul.msk.f32.gmra.mxu2 %vm417_vm1, %v61_v50  ;;  %1170 = vmatmul.msk.f32.gmra.mxu3 %vm417_vm1, %v61_v50 }
  0xec   :  { %1171 = vmatmul.msk.f32.vlgmr.msrb.gmra.mxu0 %vm417_vm1, %v62_v51  ;;  %1175 = vmatmul.msk.f32.vlgmr.msrb.gmra.mxu1 %vm417_vm1, %v62_v51 }
  0xf2   :  { %1179 = vmatmul.msk.f32.vlgmr.msrb.gmra.mxu2 %vm417_vm1, %v62_v51  ;;  %1183 = vmatmul.msk.f32.vlgmr.msrb.gmra.mxu3 %vm417_vm1, %v62_v51 }
  0xf4   :  { %1172 = vmatmul.msk.f32.gmra.mxu0 %vm417_vm1, %v63_v54  ;;  %1176 = vmatmul.msk.f32.gmra.mxu1 %vm417_vm1, %v63_v54 }
  0xfa   :  { %1180 = vmatmul.msk.f32.gmra.mxu2 %vm417_vm1, %v63_v54  ;;  %1184 = vmatmul.msk.f32.gmra.mxu3 %vm417_vm1, %v63_v54 }
  0xfc   :  { %1173 = vmatmul.msk.f32.gmra.mxu0 %vm417_vm1, %v64_v56  ;;  %1177 = vmatmul.msk.f32.gmra.mxu1 %vm417_vm1, %v64_v56 }
 0x102   :  { %1181 = vmatmul.msk.f32.gmra.mxu2 %vm417_vm1, %v64_v56  ;;  %1185 = vmatmul.msk.f32.gmra.mxu3 %vm417_vm1, %v64_v56  ;;  %v70_v56 = vld [vmem:[%s1631_s7] sm:$0xff] }
 0x104   :  { %1174 = vmatmul.msk.f32.gmra.mxu0 %vm417_vm1, %v65_v58  ;;  %1178 = vmatmul.msk.f32.gmra.mxu1 %vm417_vm1, %v65_v58 }
 0x10a   :  { %1182 = vmatmul.msk.f32.gmra.mxu2 %vm417_vm1, %v65_v58  ;;  %1186 = vmatmul.msk.f32.gmra.mxu3 %vm417_vm1, %v65_v58 }
 0x10f   :  { %v708_v18 = vpop.permute.xlu2 %707 }
 0x117   :  { %v703_v37 = vpop.permute.xlu2 %702 }
 0x147   :  { %v447_v60 = vpop.f32.mrf.mxu0  ;;  %v476_v61 = vpop.f32.mrf.mxu1 }
 0x151   :  { %v450_v62 = vpop.f32.mrf.mxu0  ;;  %v479_v63 = vpop.f32.mrf.mxu1 }
 0x154   :  { %v1506_v0 = vpop.f32.mrf.mxu2  ;;  %v1508_v1 = vpop.f32.mrf.mxu3 }
 0x159   :  { %v453_v2 = vpop.f32.mrf.mxu0  ;;  %v482_v3 = vpop.f32.mrf.mxu1 }
 0x15d   :  { %v1510_v4 = vpop.f32.mrf.mxu2  ;;  %v1512_v5 = vpop.f32.mrf.mxu3 }
 0x161   :  { %v456_v6 = vpop.f32.mrf.mxu0  ;;  %v485_v7 = vpop.f32.mrf.mxu1 }
 0x165   :  { %v1514_v8 = vpop.f32.mrf.mxu2  ;;  %v1516_v9 = vpop.f32.mrf.mxu3 }
 0x169   :  { %v575_v10 = vpop.f32.mrf.mxu0  ;;  %v604_v11 = vpop.f32.mrf.mxu1 }
 0x16a   :  { %v674_v35 = vmax.f32 %v447_v60, %v575_v10  ;;  %v675_v36 = vmax.f32 %v476_v61, %v604_v11 }
 0x16c   :  { %v710_v46 = vadd.f32 %v693_v45, %v674_v35  ;;  %v711_v47 = vadd.f32 %v693_v45, %v675_v36 }
 0x16d   :  { %v1518_v12 = vpop.f32.mrf.mxu2  ;;  %v1520_v13 = vpop.f32.mrf.mxu3 }
 0x16e   :  { %v726_v52 = vmax.f32 %v710_v46, 0.0  ;;  %v727_v53 = vmax.f32 %v711_v47, 0.0 }
 0x171   :  { %v578_v14 = vpop.f32.mrf.mxu0  ;;  %v607_v15 = vpop.f32.mrf.mxu1 }
 0x172   :  { %v678_v27 = vmax.f32 %v450_v62, %v578_v14  ;;  %v679_v28 = vmax.f32 %v479_v63, %v607_v15 }
 0x174   :  { %v714_v41 = vadd.f32 %v698_v33, %v678_v27  ;;  %v715_v42 = vadd.f32 %v698_v33, %v679_v28 }
 0x175   :  { %v1522_v16 = vpop.f32.mrf.mxu2  ;;  %v1524_v17 = vpop.f32.mrf.mxu3 }
 0x176   :  { %v730_v50 = vmax.f32 %v714_v41, 0.0  ;;  %v731_v51 = vmax.f32 %v715_v42, 0.0  ;;  %v676_v63 = vmax.f32 %v1506_v0, %v1522_v16 }
 0x178   :  { %v712_v11 = vadd.f32 %v693_v45, %v676_v63 }
 0x179   :  { %v581_v19 = vpop.f32.mrf.mxu0  ;;  %v610_v20 = vpop.f32.mrf.mxu1 }
 0x17a   :  { %v682_v23 = vmax.f32 %v453_v2, %v581_v19  ;;  %v683_v24 = vmax.f32 %v482_v3, %v610_v20  ;;  %v677_v2 = vmax.f32 %v1508_v1, %v1524_v17  ;;  %v728_v15 = vmax.f32 %v712_v11, 0.0  ;;  %v745_v17 = vpop.permute.xlu2 %744 }
 0x17c   :  { %v718_v38 = vadd.f32 %v703_v37, %v682_v23  ;;  %v719_v34 = vadd.f32 %v703_v37, %v683_v24  ;;  %v73_v23 = vld [vmem:[%s1632_s9 + $0x8] sm:$0xff]  ;;  %v74_v24 = vld [vmem:[%s1632_s9 + $0x10] sm:$0xff] }
 0x17d   :  { %v636_v21 = vpop.f32.mrf.mxu2  ;;  %v665_v22 = vpop.f32.mrf.mxu3 }
 0x17e   :  { %v734_v48 = vmax.f32 %v718_v38, 0.0  ;;  %v735_v49 = vmax.f32 %v719_v34, 0.0  ;;  %v680_v57 = vmax.f32 %v1510_v4, %v636_v21  ;;  %v681_v60 = vmax.f32 %v1512_v5, %v665_v22  ;;  %v72_v22 = vld [vmem:[%s1632_s9] sm:$0xff]  ;;  %v852_v34 = vpop.permute.xlu0 %851 }
 0x181   :  { %v584_v25 = vpop.f32.mrf.mxu0  ;;  %v613_v26 = vpop.f32.mrf.mxu1 }
 0x182   :  { %v686_v31 = vmax.f32 %v456_v6, %v584_v25  ;;  %v687_v32 = vmax.f32 %v485_v7, %v613_v26  ;;  %v716_v7 = vadd.f32 %v698_v33, %v680_v57  ;;  %v842_v46 = vpop.permute.xlu2 %841 }
 0x184   :  { %v722_v39 = vadd.f32 %v708_v18, %v686_v31  ;;  %v723_v29 = vadd.f32 %v708_v18, %v687_v32  ;;  %v732_v0 = vmax.f32 %v716_v7, 0.0  ;;  %v75_v31 = vld [vmem:[%s1632_s9 + $0x18] sm:$0xff] }
 0x185   :  { %v639_v40 = vpop.f32.mrf.mxu2  ;;  %v668_v30 = vpop.f32.mrf.mxu3 }
 0x186   :  { %v738_v43 = vmax.f32 %v722_v39, 0.0  ;;  %v739_v44 = vmax.f32 %v723_v29, 0.0  ;;  %v684_v54 = vmax.f32 %v1514_v8, %v639_v40  ;;  %v685_v55 = vmax.f32 %v1516_v9, %v668_v30  ;;  %v847_v39 = vpop.permute.xlu1 %846 }
 0x187   :  { %v717_v8 = vadd.f32 %v698_v33, %v681_v60 }
 0x188   :  { %762 = vmatpush.msra.mxu0 %v738_v43  ;;  %782 = vmatpush.msra.mxu1 %v739_v44  ;;  %v720_v3 = vadd.f32 %v703_v37, %v684_v54  ;;  %v721_v4 = vadd.f32 %v703_v37, %v685_v55 }
 0x189   :  { %v733_v1 = vmax.f32 %v717_v8, 0.0 }
 0x18a   :  { %763 = vmatpush.msra.mxu0 %v734_v48  ;;  %783 = vmatpush.msra.mxu1 %v735_v49  ;;  %v737_v14 = vmax.f32 %v721_v4, 0.0 }
 0x18c   :  { %764 = vmatpush.msra.mxu0 %v730_v50  ;;  %784 = vmatpush.msra.mxu1 %v731_v51  ;;  %v837_v51 = vpop.permute.xlu0 %836 }
 0x18d   :  { %v642_v58 = vpop.f32.mrf.mxu2  ;;  %v671_v59 = vpop.f32.mrf.mxu3 }
 0x18e   :  { %v688_v61 = vmax.f32 %v1518_v12, %v642_v58  ;;  %v689_v62 = vmax.f32 %v1520_v13, %v671_v59  ;;  %765 = vmatpush.msra.mxu0 %v726_v52  ;;  %785 = vmatpush.msra.mxu1 %v727_v53  ;;  %v713_v12 = vadd.f32 %v693_v45, %v677_v2  ;;  %v736_v13 = vmax.f32 %v720_v3, 0.0  ;;  %v81_v3 = vld [vmem:[%s1634_s11 + $0x8] sm:$0xff] }
 0x18f   :  { %1187 = vmatmul.msk.f32.vlgmr.msra.gmra.mxu0 %vm417_vm1, %v70_v56  ;;  %1188 = vmatmul.msk.f32.vlgmr.msra.gmra.mxu1 %vm417_vm1, %v70_v56 }
 0x190   :  { %v724_v6 = vadd.f32 %v708_v18, %v688_v61  ;;  %v725_v5 = vadd.f32 %v708_v18, %v689_v62  ;;  %v729_v16 = vmax.f32 %v713_v12, 0.0  ;;  %v80_v62 = vld [vmem:[%s1634_s11] sm:$0xff] }
 0x192   :  { %v740_v9 = vmax.f32 %v724_v6, 0.0  ;;  %v741_v10 = vmax.f32 %v725_v5, 0.0 }
 0x194   :  { %802 = vmatpush.msra.mxu2 %v740_v9  ;;  %822 = vmatpush.msra.mxu3 %v741_v10 }
 0x196   :  { %803 = vmatpush.msra.mxu2 %v736_v13  ;;  %823 = vmatpush.msra.mxu3 %v737_v14 }
 0x198   :  { %804 = vmatpush.msra.mxu2 %v732_v0  ;;  %824 = vmatpush.msra.mxu3 %v733_v1 }
 0x19a   :  { %805 = vmatpush.msra.mxu2 %v728_v15  ;;  %825 = vmatpush.msra.mxu3 %v729_v16 }
 0x19b   :  { %1189 = vmatmul.msk.f32.vlgmr.msra.gmra.mxu2 %vm417_vm1, %v70_v56  ;;  %1190 = vmatmul.msk.f32.vlgmr.msra.gmra.mxu3 %vm417_vm1, %v70_v56 }
 0x20c   :  { %v767_v18 = vpop.f32.mrf.mxu0  ;;  %v787_v19 = vpop.f32.mrf.mxu1 }
 0x20d   :  { %v768_v20 = vadd.f32 %v767_v18, %v745_v17  ;;  %v788_v21 = vadd.f32 %v787_v19, %v745_v17 }
 0x20f   :  { %830 = vst [vmem:[%s1633_s14] sm:$0xff] %v768_v20  ;;  %882 = vmatpush.msrb.mxu0 %v768_v20  ;;  %911 = vmatpush.msrb.mxu1 %v788_v21  ;;  %v1002_v20 = vpop.permute.xlu1 %1001 }
 0x210   :  { %831 = vst [vmem:[%s1633_s14 + $0x8] sm:$0xff] %v788_v21  ;;  %1191 = vmatmul.msk.f32.vlgmr.msrb.gmra.mxu0 %vm854_vm2, %v72_v22  ;;  %1195 = vmatmul.msk.f32.vlgmr.msrb.gmra.mxu1 %vm854_vm2, %v72_v22 }
 0x218   :  { %1192 = vmatmul.msk.f32.gmra.mxu0 %vm854_vm2, %v73_v23  ;;  %1196 = vmatmul.msk.f32.gmra.mxu1 %vm854_vm2, %v73_v23 }
 0x21e   :  { %v807_v25 = vpop.f32.mrf.mxu2  ;;  %v827_v26 = vpop.f32.mrf.mxu3 }
 0x21f   :  { %v808_v27 = vadd.f32 %v807_v25, %v745_v17  ;;  %v828_v28 = vadd.f32 %v827_v26, %v745_v17  ;;  %v1007_v25 = vpop.permute.xlu2 %1006 }
 0x220   :  { %1193 = vmatmul.msk.f32.gmra.mxu0 %vm854_vm2, %v74_v24  ;;  %1197 = vmatmul.msk.f32.gmra.mxu1 %vm854_vm2, %v74_v24 }
 0x221   :  { %832 = vst [vmem:[%s1633_s14 + $0x10] sm:$0xff] %v808_v27  ;;  %940 = vmatpush.msrb.mxu2 %v808_v27  ;;  %969 = vmatpush.msrb.mxu3 %v828_v28 }
 0x222   :  { %833 = vst [vmem:[%s1633_s14 + $0x18] sm:$0xff] %v828_v28  ;;  %1199 = vmatmul.msk.f32.vlgmr.msrb.gmra.mxu2 %vm854_vm2, %v72_v22  ;;  %1203 = vmatmul.msk.f32.vlgmr.msrb.gmra.mxu3 %vm854_vm2, %v72_v22 }
 0x228   :  { %1194 = vmatmul.msk.f32.gmra.mxu0 %vm854_vm2, %v75_v31  ;;  %1198 = vmatmul.msk.f32.gmra.mxu1 %vm854_vm2, %v75_v31 }
 0x22a   :  { %1200 = vmatmul.msk.f32.gmra.mxu2 %vm854_vm2, %v73_v23  ;;  %1204 = vmatmul.msk.f32.gmra.mxu3 %vm854_vm2, %v73_v23 }
 0x232   :  { %1201 = vmatmul.msk.f32.gmra.mxu2 %vm854_vm2, %v74_v24  ;;  %1205 = vmatmul.msk.f32.gmra.mxu3 %vm854_vm2, %v74_v24 }
 0x23a   :  { %1202 = vmatmul.msk.f32.gmra.mxu2 %vm854_vm2, %v75_v31  ;;  %1206 = vmatmul.msk.f32.gmra.mxu3 %vm854_vm2, %v75_v31 }
 0x28d   :  { %v884_v32 = vpop.f32.mrf.mxu0  ;;  %v913_v35 = vpop.f32.mrf.mxu1 }
 0x28e   :  { %v885_v52 = vadd.f32 %v884_v32, %v837_v51  ;;  %v914_v53 = vadd.f32 %v913_v35, %v837_v51 }
 0x290   :  { %v983_v58 = vmax.f32 %v885_v52, 0.0  ;;  %v984_v59 = vmax.f32 %v914_v53, 0.0 }
 0x295   :  { %v887_v36 = vpop.f32.mrf.mxu0  ;;  %v916_v37 = vpop.f32.mrf.mxu1 }
 0x296   :  { %v888_v47 = vadd.f32 %v887_v36, %v842_v46  ;;  %v917_v48 = vadd.f32 %v916_v37, %v842_v46 }
 0x298   :  { %v987_v56 = vmax.f32 %v888_v47, 0.0  ;;  %v988_v57 = vmax.f32 %v917_v48, 0.0 }
 0x29d   :  { %v890_v33 = vpop.f32.mrf.mxu0  ;;  %v919_v38 = vpop.f32.mrf.mxu1 }
 0x29e   :  { %v891_v30 = vadd.f32 %v890_v33, %v847_v39  ;;  %v920_v41 = vadd.f32 %v919_v38, %v847_v39 }
 0x2a0   :  { %v991_v54 = vmax.f32 %v891_v30, 0.0  ;;  %v992_v55 = vmax.f32 %v920_v41, 0.0 }
 0x2a5   :  { %v893_v29 = vpop.f32.mrf.mxu0  ;;  %v922_v40 = vpop.f32.mrf.mxu1 }
 0x2a6   :  { %v894_v42 = vadd.f32 %v893_v29, %v852_v34  ;;  %v923_v43 = vadd.f32 %v922_v40, %v852_v34  ;;  %v942_v44 = vpop.f32.mrf.mxu2  ;;  %v971_v45 = vpop.f32.mrf.mxu3 }
 0x2a7   :  { %v943_v14 = vadd.f32 %v942_v44, %v837_v51  ;;  %v972_v0 = vadd.f32 %v971_v45, %v837_v51 }
 0x2a8   :  { %v995_v49 = vmax.f32 %v894_v42, 0.0  ;;  %v996_v50 = vmax.f32 %v923_v43, 0.0 }
 0x2a9   :  { %v985_v18 = vmax.f32 %v943_v14, 0.0  ;;  %v986_v19 = vmax.f32 %v972_v0, 0.0 }
 0x2aa   :  { %1027 = vmatpush.msra.mxu0 %v995_v49  ;;  %1050 = vmatpush.msra.mxu1 %v996_v50 }
 0x2ac   :  { %1028 = vmatpush.msra.mxu0 %v991_v54  ;;  %1051 = vmatpush.msra.mxu1 %v992_v55 }
 0x2ae   :  { %v945_v60 = vpop.f32.mrf.mxu2  ;;  %v974_v61 = vpop.f32.mrf.mxu3  ;;  %1029 = vmatpush.msra.mxu0 %v987_v56  ;;  %1052 = vmatpush.msra.mxu1 %v988_v57 }
 0x2af   :  { %v946_v10 = vadd.f32 %v945_v60, %v842_v46  ;;  %v975_v11 = vadd.f32 %v974_v61, %v842_v46 }
 0x2b0   :  { %1030 = vmatpush.msra.mxu0 %v983_v58  ;;  %1053 = vmatpush.msra.mxu1 %v984_v59 }
 0x2b1   :  { %1207 = vmatmul.msk.f32.vlgmr.msra.gmra.mxu0 %vm417_vm1, %v80_v62  ;;  %1209 = vmatmul.msk.f32.vlgmr.msra.gmra.mxu1 %vm417_vm1, %v80_v62  ;;  %v989_v16 = vmax.f32 %v946_v10, 0.0  ;;  %v990_v17 = vmax.f32 %v975_v11, 0.0 }
 0x2b6   :  { %v948_v63 = vpop.f32.mrf.mxu2  ;;  %v977_v2 = vpop.f32.mrf.mxu3 }
 0x2b7   :  { %v949_v5 = vadd.f32 %v948_v63, %v847_v39  ;;  %v978_v7 = vadd.f32 %v977_v2, %v847_v39 }
 0x2b9   :  { %1208 = vmatmul.msk.f32.gmra.mxu0 %vm417_vm1, %v81_v3  ;;  %1210 = vmatmul.msk.f32.gmra.mxu1 %vm417_vm1, %v81_v3  ;;  %v993_v1 = vmax.f32 %v949_v5, 0.0  ;;  %v994_v15 = vmax.f32 %v978_v7, 0.0 }
 0x2be   :  { %v951_v4 = vpop.f32.mrf.mxu2  ;;  %v980_v6 = vpop.f32.mrf.mxu3 }
 0x2bf   :  { %v952_v8 = vadd.f32 %v951_v4, %v852_v34  ;;  %v981_v9 = vadd.f32 %v980_v6, %v852_v34 }
 0x2c1   :  { %v997_v12 = vmax.f32 %v952_v8, 0.0  ;;  %v998_v13 = vmax.f32 %v981_v9, 0.0 }
 0x2c3   :  { %1073 = vmatpush.msra.mxu2 %v997_v12  ;;  %1096 = vmatpush.msra.mxu3 %v998_v13 }
 0x2c5   :  { %1074 = vmatpush.msra.mxu2 %v993_v1  ;;  %1097 = vmatpush.msra.mxu3 %v994_v15 }
 0x2c7   :  { %1075 = vmatpush.msra.mxu2 %v989_v16  ;;  %1098 = vmatpush.msra.mxu3 %v990_v17 }
 0x2c9   :  { %1076 = vmatpush.msra.mxu2 %v985_v18  ;;  %1099 = vmatpush.msra.mxu3 %v986_v19 }
 0x2ca   :  { %1211 = vmatmul.msk.f32.vlgmr.msra.gmra.mxu2 %vm417_vm1, %v80_v62  ;;  %1213 = vmatmul.msk.f32.vlgmr.msra.gmra.mxu3 %vm417_vm1, %v80_v62 }
 0x2d2   :  { %1212 = vmatmul.msk.f32.gmra.mxu2 %vm417_vm1, %v81_v3  ;;  %1214 = vmatmul.msk.f32.gmra.mxu3 %vm417_vm1, %v81_v3 }
 0x32e   :  { %v1032_v21 = vpop.f32.mrf.mxu0  ;;  %v1055_v22 = vpop.f32.mrf.mxu1 }
 0x32f   :  { %v1033_v23 = vadd.f32 %v1032_v21, %v1002_v20  ;;  %v1056_v24 = vadd.f32 %v1055_v22, %v1002_v20 }
 0x331   :  { %1107 = vst [vmem:[%s1635_s13] sm:$0xff] %v1033_v23 }
 0x332   :  { %1108 = vst [vmem:[%s1635_s13 + $0x8] sm:$0xff] %v1056_v24 }
 0x336   :  { %v1035_v26 = vpop.f32.mrf.mxu0  ;;  %v1058_v27 = vpop.f32.mrf.mxu1 }
 0x337   :  { %v1036_v28 = vadd.f32 %v1035_v26, %v1007_v25  ;;  %v1059_v31 = vadd.f32 %v1058_v27, %v1007_v25 }
 0x339   :  { %1111 = vst [vmem:[%s1635_s13 + $0x20] sm:$0xff] %v1036_v28 }
 0x33a   :  { %1112 = vst [vmem:[%s1635_s13 + $0x28] sm:$0xff] %v1059_v31 }
 0x34d   :  { %v1078_v32 = vpop.f32.mrf.mxu2  ;;  %v1101_v35 = vpop.f32.mrf.mxu3 }
 0x34e   :  { %v1079_v36 = vadd.f32 %v1078_v32, %v1002_v20  ;;  %v1102_v37 = vadd.f32 %v1101_v35, %v1002_v20 }
 0x350   :  { %1109 = vst [vmem:[%s1635_s13 + $0x10] sm:$0xff] %v1079_v36 }
 0x351   :  { %1110 = vst [vmem:[%s1635_s13 + $0x18] sm:$0xff] %v1102_v37 }
 0x355   :  { %v1081_v33 = vpop.f32.mrf.mxu2  ;;  %v1104_v38 = vpop.f32.mrf.mxu3 }
 0x356   :  { %v1082_v34 = vadd.f32 %v1081_v33, %v1007_v25  ;;  %v1105_v39 = vadd.f32 %v1104_v38, %v1007_v25 }
 0x358   :  { %1113 = vst [vmem:[%s1635_s13 + $0x30] sm:$0xff] %v1082_v34 }
 0x359   :  { %1114 = vst [vmem:[%s1635_s13 + $0x38] sm:$0xff] %v1105_v39 }

</bundles_post_ra>
